<compile_context>
chip_gen: v7x
topology: tpu7x:2x2x1
jax: 0.10.0
libtpu: 0.0.40
codegen_flags: <defaults>
</compile_context>

<pallas_src>
import functools

import jax
import jax.numpy as jnp
from jax.experimental import pallas as pl
from jax.experimental.pallas import tpu as pltpu


# ------------------------------ helpers -------------------------------------

def _round_up(v, m):
    return ((v + m - 1) // m) * m


def _largest_divisor_tile(dim, cap, unit=128):
    """Largest multiple of `unit` that divides `dim` and is <= cap (min `unit`)."""
    best = unit
    t = unit
    limit = min(dim, cap)
    while t <= limit:
        if dim % t == 0:
            best = t
        t += unit
    return best


def _vmem_budget_bytes():
    """Per-generation VMEM budget: ~75% of physical, capped at 100 MiB.

    v7x -> ~48 MiB, v5e/v6e -> ~96 MiB. Falls back to the v7x-safe value if the
    hardware query is unavailable.
    """
    try:
        cap = int(pltpu.get_tpu_info().vmem_capacity_bytes)
    except Exception:
        cap = 64 * 1024 * 1024
    return min(int(cap * 3 // 4), 100 * 1024 * 1024)


# ----------------------------- Pallas kernels --------------------------------

def _fc_kernel_single(x_ref, w_ref, b_ref, o_ref, *, apply_relu):
    """One-shot y = x @ w + b (K dimension fully resident, no accumulator)."""
    out = jnp.dot(x_ref[...], w_ref[...], preferred_element_type=jnp.float32)
    out = out + b_ref[...].astype(jnp.float32)
    if apply_relu:
        out = jnp.maximum(out, 0.0)
    o_ref[...] = out.astype(o_ref.dtype)


def _fc_kernel_ktiled_inplace(x_ref, w_ref, b_ref, o_ref, *, apply_relu):
    """K-tiled matmul accumulating directly into the resident f32 output block."""
    k = pl.program_id(2)

    @pl.when(k == 0)
    def _():
        o_ref[...] = jnp.zeros_like(o_ref)

    o_ref[...] += jnp.dot(x_ref[...], w_ref[...],
                          preferred_element_type=jnp.float32)

    @pl.when(k == pl.num_programs(2) - 1)
    def _():
        out = o_ref[...] + b_ref[...].astype(jnp.float32)
        if apply_relu:
            out = jnp.maximum(out, 0.0)
        o_ref[...] = out


def _fc_kernel_ktiled_acc(x_ref, w_ref, b_ref, o_ref, acc_ref, *, apply_relu):
    """K-tiled matmul with an f32 VMEM accumulator (used for bf16 outputs)."""
    k = pl.program_id(2)

    @pl.when(k == 0)
    def _():
        acc_ref[...] = jnp.zeros_like(acc_ref)

    acc_ref[...] += jnp.dot(x_ref[...], w_ref[...],
                            preferred_element_type=jnp.float32)

    @pl.when(k == pl.num_programs(2) - 1)
    def _():
        out = acc_ref[...] + b_ref[...].astype(jnp.float32)
        if apply_relu:
            out = jnp.maximum(out, 0.0)
        o_ref[...] = out.astype(o_ref.dtype)


def _fused_mlp_kernel(x_ref, w1_ref, b1_ref, w2_ref, b2_ref, o_ref):
    """y = relu(x @ w1 + b1) @ w2 + b2 with the bf16 intermediate kept on-chip."""
    h = jnp.dot(x_ref[...], w1_ref[...], preferred_element_type=jnp.float32)
    h = jnp.maximum(h + b1_ref[...].astype(jnp.float32), 0.0).astype(jnp.bfloat16)
    out = jnp.dot(h, w2_ref[...], preferred_element_type=jnp.float32)
    o_ref[...] = out + b2_ref[...].astype(jnp.float32)


# ----------------------------- pallas_call wrappers --------------------------

def _fc_call(x_p, w_p, b_p, *, tm, out_dtype, apply_relu, vmem_budget):
    """x_p: (Bp, Dp) bf16, w_p: (Dp, Op) bf16, b_p: (1, Op) f32. 128-aligned."""
    Bp, Dp = x_p.shape
    Dp2, Op = w_p.shape
    assert Dp == Dp2 and Bp % tm == 0 and Dp % 128 == 0 and Op % 128 == 0
    out_itemsize = jnp.dtype(out_dtype).itemsize
    needs_acc = jnp.dtype(out_dtype) != jnp.dtype(jnp.float32)

    # ---- tile selection ------------------------------------------------
    tn = _largest_divisor_tile(Op, cap=1024)
    # Keep >=2 parallel blocks where possible so a 2nd TensorCore (v7x) has work.
    if Bp // tm == 1 and Op // tn == 1 and Op >= 256:
        tn = _largest_divisor_tile(Op, cap=Op // 2)

    def resident_bytes(tk_, with_acc):
        return (2 * tm * tk_ * 2          # x block, bf16, double-buffered
                + 2 * tk_ * tn * 2        # w block, bf16, double-buffered
                + 2 * tn * 4              # bias block
                + 2 * tm * tn * out_itemsize   # output block
                + (tm * tn * 4 if with_acc else 0))

    single_step = resident_bytes(Dp, False) <= vmem_budget
    if single_step:
        tk = Dp
    else:
        tk = _largest_divisor_tile(Dp, cap=1024)
        while tk > 128 and resident_bytes(tk, needs_acc) > vmem_budget:
            tk = _largest_divisor_tile(Dp, cap=tk - 128)

    n_i, n_j = Bp // tm, Op // tn
    cost = pl.CostEstimate(
        flops=2 * Bp * Dp * Op,
        transcendentals=0,
        bytes_accessed=int(x_p.size * 2 * n_j        # x re-read per output-col block
                           + w_p.size * 2 * n_i      # w re-read per output-row block
                           + b_p.size * 4 * n_i
                           + Bp * Op * out_itemsize),
    )

    if single_step:
        return pl.pallas_call(
            functools.partial(_fc_kernel_single, apply_relu=apply_relu),
            out_shape=jax.ShapeDtypeStruct((Bp, Op), out_dtype),
            grid_spec=pltpu.PrefetchScalarGridSpec(
                num_scalar_prefetch=0,
                grid=(n_i, n_j),
                in_specs=[
                    pl.BlockSpec((tm, Dp), lambda i, j: (i, 0)),
                    pl.BlockSpec((Dp, tn), lambda i, j: (0, j)),
                    pl.BlockSpec((1, tn), lambda i, j: (0, j)),
                ],
                out_specs=pl.BlockSpec((tm, tn), lambda i, j: (i, j)),
            ),
            compiler_params=pltpu.CompilerParams(
                dimension_semantics=("parallel", "parallel"),
                vmem_limit_bytes=vmem_budget,
            ),
            cost_estimate=cost,
        )(x_p, w_p, b_p)

    # ---- K-tiled fallback (very large contraction dim) -------------------
    if needs_acc:
        kernel = functools.partial(_fc_kernel_ktiled_acc, apply_relu=apply_relu)
        scratch = [pltpu.VMEM((tm, tn), jnp.float32)]
    else:
        kernel = functools.partial(_fc_kernel_ktiled_inplace, apply_relu=apply_relu)
        scratch = []
    return pl.pallas_call(
        kernel,
        out_shape=jax.ShapeDtypeStruct((Bp, Op), out_dtype),
        grid_spec=pltpu.PrefetchScalarGridSpec(
            num_scalar_prefetch=0,
            grid=(n_i, n_j, Dp // tk),
            in_specs=[
                pl.BlockSpec((tm, tk), lambda i, j, k: (i, k)),
                pl.BlockSpec((tk, tn), lambda i, j, k: (k, j)),
                pl.BlockSpec((1, tn), lambda i, j, k: (0, j)),
            ],
            out_specs=pl.BlockSpec((tm, tn), lambda i, j, k: (i, j)),
            scratch_shapes=scratch,
        ),
        compiler_params=pltpu.CompilerParams(
            dimension_semantics=("parallel", "parallel", "arbitrary"),
            vmem_limit_bytes=vmem_budget,
        ),
        cost_estimate=cost,
    )(x_p, w_p, b_p)


def _fused_mlp_call(x_p, w1, b1, w2, b2, *, tm, vmem_budget):
    """Fused fc1 -> ReLU -> fc2; intermediate never touches HBM."""
    Bp, Dp = x_p.shape
    _, Mp = w1.shape
    _, Op = w2.shape
    assert Bp % tm == 0 and w2.shape[0] == Mp
    cost = pl.CostEstimate(
        flops=2 * Bp * Dp * Mp + 2 * Bp * Mp * Op,
        transcendentals=0,
        bytes_accessed=int(x_p.size * 2 + w1.size * 2 + b1.size * 4
                           + w2.size * 2 + b2.size * 4 + Bp * Op * 4),
    )
    return pl.pallas_call(
        _fused_mlp_kernel,
        out_shape=jax.ShapeDtypeStruct((Bp, Op), jnp.float32),
        grid_spec=pltpu.PrefetchScalarGridSpec(
            num_scalar_prefetch=0,
            grid=(Bp // tm,),
            in_specs=[
                pl.BlockSpec((tm, Dp), lambda i: (i, 0)),
                pl.BlockSpec((Dp, Mp), lambda i: (0, 0)),   # weight resident across grid
                pl.BlockSpec((1, Mp), lambda i: (0, 0)),
                pl.BlockSpec((Mp, Op), lambda i: (0, 0)),
                pl.BlockSpec((1, Op), lambda i: (0, 0)),
            ],
            out_specs=pl.BlockSpec((tm, Op), lambda i: (i, 0)),
        ),
        compiler_params=pltpu.CompilerParams(
            dimension_semantics=("parallel",),
            vmem_limit_bytes=vmem_budget,
        ),
        cost_estimate=cost,
    )(x_p, w1, b1, w2, b2)


def _prep_linear(w, b, D, O):
    """Pre-transpose / lane-pad / bf16-cast an nn.Linear weight (O, D) once at init."""
    D_pad = _round_up(D, 128)
    O_pad = _round_up(O, 128)
    w_t = jnp.zeros((D_pad, O_pad), jnp.bfloat16)
    w_t = w_t.at[:D, :O].set(w.T.astype(jnp.bfloat16))
    b_p = jnp.zeros((1, O_pad), jnp.float32).at[0, :O].set(b.astype(jnp.float32))
    return dict(w=w_t, b=b_p, D=D, O=O, D_pad=D_pad, O_pad=O_pad)


# --------------------------- ConcatSummary module ----------------------------

class ConcatSummaryPallas:
    """ConcatSummary with with_fc=True.

    middepth == 0 : concat -> [Dropout(p=0)] -> Linear(indepth, outdepth)
    middepth  > 0 : concat -> Linear(indepth, middepth) -> ReLU -> Linear(middepth, outdepth)
    """

    def __init__(self, indepth, middepth=0, outdepth=1000, key=None):
        if key is None:
            key = jax.random.PRNGKey(0)
        self.indepth = indepth
        self.middepth = middepth
        self.outdepth = outdepth
        self.vmem_budget = _vmem_budget_bytes()
        if middepth == 0:
            k1, k2 = jax.random.split(key, 2)
            bound = 1.0 / (indepth ** 0.5)  # mimic nn.Linear default init range
            self.w = jax.random.uniform(k1, (outdepth, indepth), jnp.float32, -bound, bound)
            self.b = jax.random.uniform(k2, (outdepth,), jnp.float32, -bound, bound)
            self.layer1 = _prep_linear(self.w, self.b, indepth, outdepth)
            self.layer2 = None
        else:
            k1, k2, k3, k4 = jax.random.split(key, 4)
            b1 = 1.0 / (indepth ** 0.5)
            b2 = 1.0 / (middepth ** 0.5)
            self.w1 = jax.random.uniform(k1, (middepth, indepth), jnp.float32, -b1, b1)
            self.b1 = jax.random.uniform(k2, (middepth,), jnp.float32, -b1, b1)
            self.w2 = jax.random.uniform(k3, (outdepth, middepth), jnp.float32, -b2, b2)
            self.b2 = jax.random.uniform(k4, (outdepth,), jnp.float32, -b2, b2)
            self.layer1 = _prep_linear(self.w1, self.b1, indepth, middepth)
            self.layer2 = _prep_linear(self.w2, self.b2, middepth, outdepth)
        # TODO(synk): Dropout is identity here (p=0 default / eval mode); training-time
        # stochastic dropout would use pltpu.prng_seed + pltpu.stateful_bernoulli.

    def __call__(self, xs):
        if not isinstance(xs, (list, tuple)):
            xs = [xs]
        B = xs[0].shape[0]
        D = sum(int(x.shape[1]) for x in xs)
        l1 = self.layer1
        assert D == l1["D"], (D, l1["D"])
        budget = self.vmem_budget

        # tm multiple of 16 so bf16 rows fill sublanes; cap 512.
        tm = min(_round_up(max(B, 1), 16), 512)
        Bp = _round_up(B, tm)
        # Prefer >=2 row blocks when the batch allows it (keeps v7x's 2nd TC busy).
        if Bp // tm == 1 and Bp % 32 == 0:
            tm //= 2

        # glue: torch.cat(x, dim=1) fused with the bf16 cast and the K zero-pad
        # (single half-width HBM materialization).
        # TODO(synk): fully fold the concat into the kernel via scalar-prefetched
        # per-segment offsets in the LHS index_map to remove this copy entirely.
        parts = [x.astype(jnp.bfloat16) for x in xs]
        if l1["D_pad"] > D:
            parts.append(jnp.zeros((B, l1["D_pad"] - D), jnp.bfloat16))
        x = jnp.concatenate(parts, axis=1) if len(parts) > 1 else parts[0]
        if Bp > B:
            x = jnp.pad(x, ((0, Bp - B), (0, 0)))

        if self.middepth == 0:
            y = _fc_call(x, l1["w"], l1["b"], tm=tm, out_dtype=jnp.float32,
                         apply_relu=False, vmem_budget=budget)
            return y[:B, :l1["O"]]

        l2 = self.layer2
        assert l1["O_pad"] == l2["D_pad"], (l1["O_pad"], l2["D_pad"])
        Dp, Mp, Op = l1["D_pad"], l1["O_pad"], l2["O_pad"]
        fused_bytes = (2 * tm * Dp * 2          # x block (double-buffered)
                       + 2 * Dp * Mp * 2        # w1
                       + 2 * Mp * 4             # b1
                       + 2 * Mp * Op * 2        # w2
                       + 2 * Op * 4             # b2
                       + 2 * tm * Op * 4        # output block
                       + tm * Mp * 4 + tm * Mp * 2)  # intermediate h (f32 + bf16)
        if fused_bytes <= budget:
            # fc1 + ReLU + fc2 in one pallas_call; h never round-trips to HBM.
            y = _fused_mlp_call(x, l1["w"], l1["b"], l2["w"], l2["b"],
                                tm=tm, vmem_budget=budget)
        else:
            h = _fc_call(x, l1["w"], l1["b"], tm=tm, out_dtype=jnp.bfloat16,
                         apply_relu=True, vmem_budget=budget)
            y = _fc_call(h, l2["w"], l2["b"], tm=tm, out_dtype=jnp.float32,
                         apply_relu=False, vmem_budget=budget)
        return y[:B, :l2["O"]]


# --------------------------------- main --------------------------------------

if __name__ == "__main__":
    key = jax.random.PRNGKey(0)
    k_x1, k_x2, k_p1, k_p2 = jax.random.split(key, 4)

    # Two "xfc / squeeze" heads, each producing (batch, feat) vectors.
    batch, feat1, feat2, outdepth = 8, 16, 16, 16
    x1 = jax.random.normal(k_x1, (batch, feat1), jnp.float32)
    x2 = jax.random.normal(k_x2, (batch, feat2), jnp.float32)
    xc = jnp.concatenate([x1, x2], axis=1)
    bf16 = jnp.bfloat16

    # --- middepth == 0 path (default) ---
    m = ConcatSummaryPallas(indepth=feat1 + feat2, middepth=0, outdepth=outdepth, key=k_p1)
    out = jax.block_until_ready(m([x1, x2]))
    assert out.shape == (batch, outdepth)

    # reference with matching compute dtype (bf16 inputs, f32 accumulation)
    ref_bf = jnp.dot(xc.astype(bf16), m.w.T.astype(bf16),
                     preferred_element_type=jnp.float32) + m.b
    assert jnp.allclose(out, ref_bf, atol=2e-3, rtol=2e-3), \
        float(jnp.max(jnp.abs(out - ref_bf)))
    # looser sanity vs pure-f32 reference (bf16 input rounding)
    ref_f32 = xc @ m.w.T + m.b
    assert jnp.allclose(out, ref_f32, atol=5e-2, rtol=5e-2)

    # --- middepth > 0 path (fused fc1+ReLU+fc2) ---
    m2 = ConcatSummaryPallas(indepth=feat1 + feat2, middepth=32, outdepth=outdepth, key=k_p2)
    out2 = jax.block_until_ready(m2([x1, x2]))
    assert out2.shape == (batch, outdepth)
    h_ref = jnp.maximum(
        jnp.dot(xc.astype(bf16), m2.w1.T.astype(bf16),
                preferred_element_type=jnp.float32) + m2.b1, 0.0).astype(bf16)
    ref2 = jnp.dot(h_ref, m2.w2.T.astype(bf16),
                   preferred_element_type=jnp.float32) + m2.b2
    assert jnp.allclose(out2, ref2, atol=2e-2, rtol=2e-2), \
        float(jnp.max(jnp.abs(out2 - ref2)))

    print("KERNEL_OK")
</pallas_src>

<mosaic_0001>
module attributes {stable_mosaic.version = 11 : i64} {
  func.func @_fc_kernel_single(%arg0: i32, %arg1: i32, %arg2: memref<16x128xbf16, #tpu.memory_space<vmem>>, %arg3: memref<128x128xbf16, #tpu.memory_space<vmem>>, %arg4: memref<1x128xf32, #tpu.memory_space<vmem>>, %arg5: memref<16x128xf32, #tpu.memory_space<vmem>>) attributes {dimension_semantics = [#tpu.dimension_semantics<parallel>, #tpu.dimension_semantics<parallel>], iteration_bounds = array<i64: 1, 1>, scalar_prefetch = 0 : i64, scratch_operands = 0 : i64, tpu.core_type = #tpu.core_type<tc>, window_params = [{transform_indices = @transform_0, window_bounds = array<i64: 16, 128>}, {transform_indices = @transform_1, window_bounds = array<i64: 128, 128>}, {transform_indices = @transform_2, window_bounds = array<i64: 1, 128>}, {transform_indices = @transform_3, window_bounds = array<i64: 16, 128>}]} {
    %c0 = arith.constant 0 : index
    %c0_0 = arith.constant 0 : index
    %0 = vector.load %arg2[%c0, %c0_0] : memref<16x128xbf16, #tpu.memory_space<vmem>>, vector<16x128xbf16>
    %c0_1 = arith.constant 0 : index
    %c0_2 = arith.constant 0 : index
    %1 = vector.load %arg3[%c0_1, %c0_2] : memref<128x128xbf16, #tpu.memory_space<vmem>>, vector<128x128xbf16>
    %cst = arith.constant dense<0.000000e+00> : vector<16x128xf32>
    %2 = tpu.matmul %0, %1, %cst {dimension_numbers = #tpu.dot_dimension_numbers<[1], [0], [0], [1], [0, 0, 1, 1], [], []>} : vector<16x128xbf16>, vector<128x128xbf16>, vector<16x128xf32> -> vector<16x128xf32>
    %c0_3 = arith.constant 0 : index
    %c0_4 = arith.constant 0 : index
    %3 = vector.load %arg4[%c0_3, %c0_4] : memref<1x128xf32, #tpu.memory_space<vmem>>, vector<1x128xf32>
    %4 = vector.broadcast %3 : vector<1x128xf32> to vector<16x128xf32>
    %5 = arith.addf %2, %4 : vector<16x128xf32>
    %c0_5 = arith.constant 0 : index
    %c0_6 = arith.constant 0 : index
    %6 = vector.load %arg5[%c0_5, %c0_6] : memref<16x128xf32, #tpu.memory_space<vmem>>, vector<16x128xf32>
    tpu.vector_store %arg5[%c0_5, %c0_6], %5 {strides = array<i32>} : memref<16x128xf32, #tpu.memory_space<vmem>>, vector<16x128xf32>,
    return
  }
  func.func @transform_0(%arg0: i32, %arg1: i32) -> (i32, i32) {
    %c0_i32 = arith.constant 0 : i32
    %c0_i32_0 = arith.constant 0 : i32
    return %arg0, %c0_i32 : i32, i32
  }
  func.func @transform_1(%arg0: i32, %arg1: i32) -> (i32, i32) {
    %c0_i32 = arith.constant 0 : i32
    %c0_i32_0 = arith.constant 0 : i32
    return %c0_i32, %arg1 : i32, i32
  }
  func.func @transform_2(%arg0: i32, %arg1: i32) -> (i32, i32) {
    %c0_i32 = arith.constant 0 : i32
    %c0_i32_0 = arith.constant 0 : i32
    return %c0_i32, %arg1 : i32, i32
  }
  func.func @transform_3(%arg0: i32, %arg1: i32) -> (i32, i32) {
    %c0_i32 = arith.constant 0 : i32
    return %arg0, %arg1 : i32, i32
  }
}

</mosaic_0001>

<bundles_post_ra>
// kernel: tpu_custom_call.1
= control target key start
LH: loop header
LB: loop body
LE: loop exit
PB: predicated region body
PF: predicated region fallthrough
CT: control target
= control target key end

     0   :  { %8 = vsyncpa [#allocation3], 0  ;;  %s381_s0 = inlined_call_operand.hbm [shape: bf16[16,128], index: 0, kind: input, shape index: {}]   ;;  %s382_s1 = inlined_call_operand.hbm [shape: bf16[128,128], index: 1, kind: input, shape index: {}]   ;;  %s383_s2 = inlined_call_operand.vmem [shape: f32[1,128], index: 2, kind: input, shape index: {}]   ;;  %s384_s3 = inlined_call_operand.hbm [shape: f32[16,128], index: 3, kind: output, shape index: {}]  }
   0x1   :  { %9 = vsyncpa [#allocation6], 0 }
   0x2   :  { %10 = vsyncpa [#allocation4], 0  ;;  %s313_s12 = smov [#allocation2]   ;;  %s241_s16 = scalar_lea.hbm %s381_s0, 128 }
   0x3   :  { %s16_s13 = sshll.u32 %s313_s12, 4  ;;  %p242_p0 = scmp.ne.s32.totalorder %s381_s0, %s241_s16  ;;  %s17_s13 = int_to_ptr.vmem [resolvable:$true] %s16_s13 }
   0x4   :  { %p245_p1 = scmp.lt.u32.totalorder %s241_s16, %s381_s0 }
   0x6   :  { %p247_p2 = pnand %p245_p1, %p242_p0 }
   0x8   :  { %250 = shalt.err (!%p247_p2)
}
   0x9   :  { %s251_s21 = scalar_lea.vmem %s17_s13, 128  ;;  %p256_p4 = scmp.lt.s32.totalorder %s17_s13, %s17_s13 }
   0xa   :  { %p252_p3 = scmp.ne.s32.totalorder %s17_s13, %s251_s21  ;;  %p257_p5 = scmp.lt.s32.totalorder %s251_s21, %s251_s21 }
   0xc   :  { %p258_p6 = por %p257_p5, %p256_p4 }
   0xe   :  { %p259_p7 = pnand %p258_p6, %p252_p3 }
  0x10   :  { %262 = shalt.err (!%p259_p7)
}
  0x11   :  { %s314_s22 = smov 64   ;;  %s315_s23 = smov 4  }
  0x12   :  { %22 = dma.hbm_to_vmem [thread:$0]  %s381_s0, 128, %s17_s13, [#allocation3], %s314_s22, %s314_s22, %s315_s23  }
  0x13   :  { %s316_s26 = smov [#allocation5]   ;;  %s263_s30 = scalar_lea.hbm %s382_s1, 1024 }
  0x14   :  { %s28_s27 = sshll.u32 %s316_s26, 4  ;;  %p264_p8 = scmp.ne.s32.totalorder %s382_s1, %s263_s30  ;;  %s29_s27 = int_to_ptr.vmem [resolvable:$true] %s28_s27 }
  0x15   :  { %p267_p9 = scmp.lt.u32.totalorder %s263_s30, %s382_s1 }
  0x17   :  { %p269_p10 = pnand %p267_p9, %p264_p8 }
  0x19   :  { %272 = shalt.err (!%p269_p10)
}
  0x1a   :  { %s273_s8 = scalar_lea.vmem %s29_s27, 1024  ;;  %p278_p12 = scmp.lt.s32.totalorder %s29_s27, %s29_s27 }
  0x1b   :  { %p274_p11 = scmp.ne.s32.totalorder %s29_s27, %s273_s8  ;;  %p279_p13 = scmp.lt.s32.totalorder %s273_s8, %s273_s8 }
  0x1d   :  { %p280_p0 = por %p279_p13, %p278_p12 }
  0x1f   :  { %p281_p1 = pnand %p280_p0, %p274_p11 }
  0x21   :  { %284 = shalt.err (!%p281_p1)
}
  0x22   :  { %34 = dma.hbm_to_vmem [thread:$0]  %s382_s1, 1024, %s29_s27, [#allocation6], %s314_s22, %s314_s22, %s315_s23  }
  0x23   :  { %307 = dma.done.wait [#allocation3], 128  }
  0x24   :  { %308 = vsyncadd [#allocation3], 4294967168 }
  0x25   :  { %309 = dma.done.wait [#allocation6], 1024  }
  0x26   :  { %310 = vsyncadd [#allocation6], 4294966272  ;;  %v317_v0 = vmov 0.0   ;;  %vm318_vm0 = vmmov 0   ;;  %v232_v1 = vld [vmem:[#allocation5] sm:$0xff]   ;;  %v233_v2 = vld [vmem:[#allocation5 + $0x8] sm:$0xff]  }
  0x27   :  { %203 = vmatprep.subr.bf16.mxu0 %v317_v0  ;;  %219 = vmatprep.mubr.msk.bf16.mxu0 %vm318_vm0, %v317_v0  ;;  %v234_v3 = vld [vmem:[#allocation5 + $0x10] sm:$0xff]   ;;  %v235_v4 = vld [vmem:[#allocation5 + $0x18] sm:$0xff]   ;;  %v236_v5 = vld [vmem:[#allocation5 + $0x20] sm:$0xff]   ;;  %s319_s11 = smov [#allocation7]  }
  0x28   :  { %204 = vmatpush3.bf16.msra.mxu0 %v232_v1  ;;  %v237_v6 = vld [vmem:[#allocation5 + $0x28] sm:$0xff]   ;;  %v238_v7 = vld [vmem:[#allocation5 + $0x30] sm:$0xff]   ;;  %v239_v8 = vld [vmem:[#allocation5 + $0x38] sm:$0xff]   ;;  %s171_s12 = sshll.u32 %s319_s11, 4  ;;  %s172_s12 = int_to_ptr.vmem [resolvable:$true] %s171_s12 }
  0x29   :  { %205 = vmatprep.subr.bf16.mxu0 %v317_v0  ;;  %v240_v9 = vld [vmem:[#allocation2] sm:$0xff]   ;;  %s285_s13 = scalar_lea.vmem %s172_s12, 256  ;;  %p290_p3 = scmp.lt.s32.totalorder %s172_s12, %s172_s12 }
  0x2a   :  { %v184_v10 = vld [vmem:[%s383_s2] ss:$0 sm:$0xff]  ;;  %p286_p2 = scmp.ne.s32.totalorder %s172_s12, %s285_s13  ;;  %p291_p4 = scmp.lt.s32.totalorder %s285_s13, %s285_s13 }
  0x2c   :  { %206 = vmatpush3.bf16.msra.mxu0 %v233_v2  ;;  %p292_p5 = por %p291_p4, %p290_p3 }
  0x2d   :  { %207 = vmatprep.subr.bf16.mxu0 %v317_v0 }
  0x2e   :  { %p293_p6 = pnand %p292_p5, %p286_p2 }
  0x30   :  { %208 = vmatpush3.bf16.msra.mxu0 %v234_v3 }
  0x31   :  { %209 = vmatprep.subr.bf16.mxu0 %v317_v0 }
  0x34   :  { %210 = vmatpush3.bf16.msra.mxu0 %v235_v4 }
  0x35   :  { %211 = vmatprep.subr.bf16.mxu0 %v317_v0 }
  0x38   :  { %212 = vmatpush3.bf16.msra.mxu0 %v236_v5 }
  0x39   :  { %213 = vmatprep.subr.bf16.mxu0 %v317_v0 }
  0x3c   :  { %214 = vmatpush3.bf16.msra.mxu0 %v237_v6 }
  0x3d   :  { %215 = vmatprep.subr.bf16.mxu0 %v317_v0 }
  0x40   :  { %216 = vmatpush3.bf16.msra.mxu0 %v238_v7 }
  0x41   :  { %217 = vmatprep.subr.bf16.mxu0 %v317_v0 }
  0x44   :  { %218 = vmatpush3.bf16.msra.mxu0 %v239_v8 }
  0x47   :  { %220 = vmatmul.mubr.bf16.vlgmr.msra.gmra.mrb[0].mxu0 %v240_v9 }
 0x11a   :  { %v157_v11 = vpop.f32.mrb[0].mxu0 }
 0x11b   :  { %v158_v12 = vadd.f32 %v184_v10, %v157_v11  ;;  %v221_v13 = vpop.f32.mrb[1].mxu0 }
 0x11c   :  { %v160_v14 = vpop.f32.mrb[2].mxu0 }
 0x11d   :  { %164 = vst [vmem:[#allocation7] sm:$0xff] %v158_v12  ;;  %v161_v15 = vadd.f32 %v184_v10, %v160_v14  ;;  %v222_v16 = vpop.f32.mrb[3].mxu0 }
 0x11f   :  { %165 = vst [vmem:[#allocation7 + $0x8] sm:$0xff] %v161_v15 }
 0x120   :  { %296 = shalt.err (!%p293_p6)
}
 0x121   :  { %s297_s15 = scalar_lea.hbm %s384_s3, 256 }
 0x122   :  { %p298_p7 = scmp.ne.s32.totalorder %s384_s3, %s297_s15  ;;  %p301_p8 = scmp.lt.u32.totalorder %s297_s15, %s384_s3 }
 0x124   :  { %p303_p9 = pnand %p301_p8, %p298_p7 }
 0x126   :  { %306 = shalt.err (!%p303_p9)
}
 0x127   :  { %s320_s20 = smov 128   ;;  %s321_s21 = smov 8  }
 0x128   :  { %177 = dma.vmem_to_hbm [thread:$0]  %s172_s12, 256, %s384_s3, [#allocation4], %s320_s20, %s320_s20, %s321_s21  }
 0x129   :  { %311 = dma.done.wait [#allocation4], 256  }
 0x12a   :  { %312 = vsyncadd [#allocation4], 4294967040 }
 0x12b   :  { %181 = vsyncpa [#allocation3], 1 }
 0x12c   :  { %182 = vsyncpa [#allocation6], 1 }
 0x12d   :  { %183 = vsyncpa [#allocation4], 1 }

</bundles_post_ra>
